<compile_context>
chip_gen: v7x
topology: tpu7x:2x2x1
jax: 0.10.0
libtpu: 0.0.40
codegen_flags: <defaults>
</compile_context>

<pallas_src>
import functools

import jax
import jax.numpy as jnp
from jax.experimental import pallas as pl
from jax.experimental.pallas import tpu as pltpu


def _round_up(a, b):
    return (a + b - 1) // b * b


def _outconv_kernel(x_ref, w_ref, b_ref, o_ref):
    # x_ref: (1, C_in, TS)   lane-dense spatial tile of the input
    # w_ref: (C_out, C_in)   full weight (resident, constant index_map)
    # b_ref: (C_out, 1)      full bias
    # o_ref: (1, C_out, TS)  lane-dense spatial tile of the output
    c_in = x_ref.shape[1]
    c_out = o_ref.shape[1]
    ts = x_ref.shape[2]

    x = x_ref[0].astype(jnp.float32)            # (C_in, TS)
    w = w_ref[...].astype(jnp.float32)          # (C_out, C_in)
    b = b_ref[...].astype(jnp.float32)          # (C_out, 1)

    acc = jnp.broadcast_to(b, (c_out, ts))      # (C_out, TS), f32 accumulate
    for i in range(c_in):                       # unrolled VPU FMAs, no MXU
        acc = acc + w[:, i:i + 1] * x[i:i + 1, :]

    o_ref[0] = acc.astype(o_ref.dtype)          # single dense (C_out, TS) store


@functools.partial(jax.jit, static_argnames=("max_tile_s",))
def outconv_forward(x_nchw, weight, bias, *, max_tile_s=2048):
    """1x1 conv: x (N, C_in, H, W), weight (C_out, C_in, 1, 1), bias (C_out,)."""
    N, C_in, H, W = x_nchw.shape
    C_out = weight.shape[0]
    S = H * W

    # NCHW is already spatial-last once H and W are flattened — free reshapes.
    x3d = x_nchw.reshape(N, C_in, S)
    w2d = weight.reshape(C_out, C_in)
    b2d = bias.reshape(C_out, 1)

    # Spatial tile: multiple of 128 lanes, as large as reasonable.
    tile_s = min(max_tile_s, _round_up(S, 128))
    S_pad = _round_up(S, tile_s)
    if S_pad != S:
        x3d = jnp.pad(x3d, ((0, 0), (0, 0), (0, S_pad - S)))

    grid = (N, S_pad // tile_s)

    itemsize = jnp.dtype(x_nchw.dtype).itemsize
    bytes_io = (
        N * C_in * S_pad * itemsize          # input read
        + N * C_out * S_pad * itemsize       # output write
        + C_out * C_in * jnp.dtype(weight.dtype).itemsize
        + C_out * jnp.dtype(bias.dtype).itemsize
    )

    out3d = pl.pallas_call(
        _outconv_kernel,
        out_shape=jax.ShapeDtypeStruct((N, C_out, S_pad), x_nchw.dtype),
        grid_spec=pltpu.PrefetchScalarGridSpec(
            num_scalar_prefetch=0,
            grid=grid,
            in_specs=[
                pl.BlockSpec((1, C_in, tile_s), lambda n, j: (n, 0, j)),
                pl.BlockSpec((C_out, C_in), lambda n, j: (0, 0)),
                pl.BlockSpec((C_out, 1), lambda n, j: (0, 0)),
            ],
            out_specs=pl.BlockSpec((1, C_out, tile_s), lambda n, j: (n, 0, j)),
        ),
        compiler_params=pltpu.CompilerParams(
            dimension_semantics=("parallel", "parallel"),
        ),
        cost_estimate=pl.CostEstimate(
            flops=2 * N * S_pad * C_in * C_out,
            transcendentals=0,
            bytes_accessed=bytes_io,
        ),
    )(x3d, w2d, b2d)

    out = out3d[:, :, :S] if S_pad != S else out3d
    return out.reshape(N, C_out, H, W)


def outconv_reference(x_nchw, weight, bias):
    """Pure-JAX reference of nn.Conv2d(kernel_size=1)."""
    C_out, C_in = weight.shape[0], weight.shape[1]
    w2d = weight.reshape(C_out, C_in)
    y = jnp.einsum("nchw,oc->nohw", x_nchw, w2d)
    return y + bias.reshape(1, C_out, 1, 1)


if __name__ == "__main__":
    # Small shapes consistent with the module: batch=2, in_channels=4,
    # out_channels=8, spatial 16x16.
    N, C_in, C_out, H, W = 2, 4, 8, 16, 16

    key = jax.random.PRNGKey(0)
    kx, kw, kb = jax.random.split(key, 3)

    x = jax.random.normal(kx, (N, C_in, H, W), dtype=jnp.float32)
    # Deterministic parameter init (shapes from nn.Conv2d(in, out, kernel_size=1)).
    bound = 1.0 / (C_in ** 0.5)
    weight = jax.random.uniform(kw, (C_out, C_in, 1, 1), jnp.float32, -bound, bound)
    bias = jax.random.uniform(kb, (C_out,), jnp.float32, -bound, bound)

    out = outconv_forward(x, weight, bias)
    out = jax.block_until_ready(out)

    ref = outconv_reference(x, weight, bias)
    assert out.shape == (N, C_out, H, W)
    assert jnp.allclose(out, ref, atol=1e-5, rtol=1e-5)

    print("KERNEL_OK")
</pallas_src>

<mosaic_0001>
module attributes {stable_mosaic.version = 11 : i64} {
  func.func @_outconv_kernel(%arg0: i32, %arg1: i32, %arg2: memref<1x4x256xf32, #tpu.memory_space<vmem>>, %arg3: memref<8x4xf32, #tpu.memory_space<vmem>>, %arg4: memref<8x1xf32, #tpu.memory_space<vmem>>, %arg5: memref<1x8x256xf32, #tpu.memory_space<vmem>>) attributes {dimension_semantics = [#tpu.dimension_semantics<parallel>, #tpu.dimension_semantics<parallel>], iteration_bounds = array<i64: 2, 1>, scalar_prefetch = 0 : i64, scratch_operands = 0 : i64, tpu.core_type = #tpu.core_type<tc>, window_params = [{transform_indices = @transform_0, window_bounds = array<i64: 1, 4, 256>}, {pipeline_mode = #tpu.pipeline_mode<synchronous>, transform_indices = @transform_1, window_bounds = array<i64: 8, 4>}, {pipeline_mode = #tpu.pipeline_mode<synchronous>, transform_indices = @transform_2, window_bounds = array<i64: 8, 1>}, {transform_indices = @transform_3, window_bounds = array<i64: 1, 8, 256>}]} {
    %c0 = arith.constant 0 : index
    %c0_0 = arith.constant 0 : index
    %c0_1 = arith.constant 0 : index
    %0 = vector.load %arg2[%c0, %c0_0, %c0_1] : memref<1x4x256xf32, #tpu.memory_space<vmem>>, vector<1x4x256xf32>
    %1 = vector.shape_cast %0 : vector<1x4x256xf32> to vector<4x256xf32>
    %c0_2 = arith.constant 0 : index
    %c0_3 = arith.constant 0 : index
    %2 = vector.load %arg3[%c0_2, %c0_3] : memref<8x4xf32, #tpu.memory_space<vmem>>, vector<8x4xf32>
    %c0_4 = arith.constant 0 : index
    %c0_5 = arith.constant 0 : index
    %3 = vector.load %arg4[%c0_4, %c0_5] : memref<8x1xf32, #tpu.memory_space<vmem>>, vector<8x1xf32>
    %4 = vector.shape_cast %3 : vector<8x1xf32> to vector<8x1xf32>
    %5 = vector.broadcast %4 : vector<8x1xf32> to vector<8x256xf32>
    %6 = vector.extract_strided_slice %2 {offsets = [0, 0], sizes = [8, 1], strides = [1, 1]} : vector<8x4xf32> to vector<8x1xf32>
    %7 = vector.extract_strided_slice %1 {offsets = [0, 0], sizes = [1, 256], strides = [1, 1]} : vector<4x256xf32> to vector<1x256xf32>
    %8 = vector.broadcast %6 : vector<8x1xf32> to vector<8x256xf32>
    %9 = vector.broadcast %7 : vector<1x256xf32> to vector<8x256xf32>
    %10 = arith.mulf %8, %9 : vector<8x256xf32>
    %11 = arith.addf %5, %10 : vector<8x256xf32>
    %12 = vector.extract_strided_slice %2 {offsets = [0, 1], sizes = [8, 1], strides = [1, 1]} : vector<8x4xf32> to vector<8x1xf32>
    %13 = vector.extract_strided_slice %1 {offsets = [1, 0], sizes = [1, 256], strides = [1, 1]} : vector<4x256xf32> to vector<1x256xf32>
    %14 = vector.broadcast %12 : vector<8x1xf32> to vector<8x256xf32>
    %15 = vector.broadcast %13 : vector<1x256xf32> to vector<8x256xf32>
    %16 = arith.mulf %14, %15 : vector<8x256xf32>
    %17 = arith.addf %11, %16 : vector<8x256xf32>
    %18 = vector.extract_strided_slice %2 {offsets = [0, 2], sizes = [8, 1], strides = [1, 1]} : vector<8x4xf32> to vector<8x1xf32>
    %19 = vector.extract_strided_slice %1 {offsets = [2, 0], sizes = [1, 256], strides = [1, 1]} : vector<4x256xf32> to vector<1x256xf32>
    %20 = vector.broadcast %18 : vector<8x1xf32> to vector<8x256xf32>
    %21 = vector.broadcast %19 : vector<1x256xf32> to vector<8x256xf32>
    %22 = arith.mulf %20, %21 : vector<8x256xf32>
    %23 = arith.addf %17, %22 : vector<8x256xf32>
    %24 = vector.extract_strided_slice %2 {offsets = [0, 3], sizes = [8, 1], strides = [1, 1]} : vector<8x4xf32> to vector<8x1xf32>
    %25 = vector.extract_strided_slice %1 {offsets = [3, 0], sizes = [1, 256], strides = [1, 1]} : vector<4x256xf32> to vector<1x256xf32>
    %26 = vector.broadcast %24 : vector<8x1xf32> to vector<8x256xf32>
    %27 = vector.broadcast %25 : vector<1x256xf32> to vector<8x256xf32>
    %28 = arith.mulf %26, %27 : vector<8x256xf32>
    %29 = arith.addf %23, %28 : vector<8x256xf32>
    %c0_6 = arith.constant 0 : index
    %c0_7 = arith.constant 0 : index
    %c0_8 = arith.constant 0 : index
    %30 = vector.load %arg5[%c0_6, %c0_7, %c0_8] : memref<1x8x256xf32, #tpu.memory_space<vmem>>, vector<1x8x256xf32>
    %31 = vector.shape_cast %30 : vector<1x8x256xf32> to vector<8x256xf32>
    %32 = vector.shape_cast %29 : vector<8x256xf32> to vector<1x8x256xf32>
    tpu.vector_store %arg5[%c0_6, %c0_7, %c0_8], %32 {strides = array<i32>} : memref<1x8x256xf32, #tpu.memory_space<vmem>>, vector<1x8x256xf32>,
    return
  }
  func.func @transform_0(%arg0: i32, %arg1: i32) -> (i32, i32, i32) {
    %c0_i32 = arith.constant 0 : i32
    %c0_i32_0 = arith.constant 0 : i32
    return %arg0, %c0_i32, %arg1 : i32, i32, i32
  }
  func.func @transform_1(%arg0: i32, %arg1: i32) -> (i32, i32) {
    %c0_i32 = arith.constant 0 : i32
    %c0_i32_0 = arith.constant 0 : i32
    %c0_i32_1 = arith.constant 0 : i32
    return %c0_i32, %c0_i32_0 : i32, i32
  }
  func.func @transform_2(%arg0: i32, %arg1: i32) -> (i32, i32) {
    %c0_i32 = arith.constant 0 : i32
    %c0_i32_0 = arith.constant 0 : i32
    %c0_i32_1 = arith.constant 0 : i32
    return %c0_i32, %c0_i32_0 : i32, i32
  }
  func.func @transform_3(%arg0: i32, %arg1: i32) -> (i32, i32, i32) {
    %c0_i32 = arith.constant 0 : i32
    %c0_i32_0 = arith.constant 0 : i32
    return %arg0, %c0_i32, %arg1 : i32, i32, i32
  }
}

</mosaic_0001>

<bundles_post_ra>
// kernel: outconv_forward.1
= control target key start
LH: loop header
LB: loop body
LE: loop exit
PB: predicated region body
PF: predicated region fallthrough
CT: control target
= control target key end

     0   :  { %s506_s12 = smov 0   ;;  %s508_s13 = smov 0   ;;  %s549_s0 = inlined_call_operand.vmem [shape: f32[2,4,256], index: 0, kind: input, shape index: {}]   ;;  %s550_s1 = inlined_call_operand.vmem [shape: f32[8,4], index: 1, kind: input, shape index: {}]   ;;  %s551_s2 = inlined_call_operand.vmem [shape: f32[8,1], index: 2, kind: input, shape index: {}]   ;;  %s552_s3 = inlined_call_operand.vmem [shape: f32[2,8,256], index: 3, kind: output, shape index: {}]  }
   0x1   :  { %s510_s14 = smov 0  }
   0x2 LB: > { %s25_s15 = sadd.s32 1, %s476_s13  ;;  %p417_p0 = scmp.ge.s32.totalorder %s480_s14, 1  ;;  %s480_s14 = sphi %s510_s14, %s13_s14   ;;  %s476_s13 = sphi %s508_s13, %s554_s13   ;;  %s472_s12 = sphi %s506_s12, %s553_s12  }
   0x3   : > { %p27_p1 = scmp.ge.s32.totalorder %s25_s15, 2  ;;  %p158_p2 = scmp.lt.s32.totalorder %s480_s14, 3 }
   0x5   : > { %s556_s15 = smov (%p27_p1, %s25_s15), 0  ;;  %p159_p3 = pnand %p417_p0, %p158_p2 }
   0x6   : > { %v211_v0 = vld [vmem:[%s550_s1] sm:$0xff] (!%p159_p3)  ;;  %v482_v1 = vmov (!%p159_p3), 0   ;;  %v483_v2 = vmov (!%p159_p3), 1   ;;  %v484_v4 = vmov (!%p159_p3), 2   ;;  %v485_v5 = vmov (!%p159_p3), 3   ;;  %p191_p4 = scmp.lt.s32.totalorder (!%p159_p3), %s472_s12, 1 }
   0x7   : > { %162 = sbr.rel (%p159_p3) target bundleno = 150 (0x96), region = 32  ;;  %454 = vset.pattern.permute.xlu0 (!%p159_p3), %v482_v1  ;;  %455 = vset.pattern.permute.xlu1 (!%p159_p3), %v483_v2  ;;  %v212_v3 = vld [vmem:[%s551_s2] sm:$0xff] (!%p159_p3)  ;;  %v224_v6 = vlaneseq (!%p159_p3) }
   0x8   : > { %220 = vperm.xlu0 (!%p159_p3), %454, %v211_v0   ;;  %247 = vperm.xlu1 (!%p159_p3), %455, %v211_v0  }
   0x9   : > { %v225_v7 = vshrl.u32 (!%p159_p3), %v224_v6, 7 }
   0xb   : > { %v226_v8 = vsub.s32 (!%p159_p3), 0, %v225_v7  ;;  %v230_v9 = vsub.s32 (!%p159_p3), 4, %v225_v7  ;;  %v252_v11 = vsub.s32 (!%p159_p3), 1, %v225_v7  ;;  %v256_v12 = vsub.s32 (!%p159_p3), 5, %v225_v7 }
   0xc   : > { %215 = vperm.xlu0 (!%p159_p3), %454, %v212_v3   ;;  %456 = vset.pattern.permute.xlu1 (!%p159_p3), %v484_v4  ;;  %v278_v13 = vsub.s32 (!%p159_p3), 2, %v225_v7  ;;  %v282_v14 = vsub.s32 (!%p159_p3), 6, %v225_v7  ;;  %v304_v21 = vsub.s32 (!%p159_p3), 3, %v225_v7  ;;  %v308_v22 = vsub.s32 (!%p159_p3), 7, %v225_v7 }
   0xd   : > { %273 = vperm.xlu1 (!%p159_p3), %456, %v211_v0  }
   0xe   : > { %s558_s12 = smov (!%p191_p4, %s472_s12), 1 }
   0xf   : > { %s424_s20 = sshll.u32 %s558_s12, 3  ;;  %s425_s24 = sshll.u32 %s558_s12, 4 }
  0x10   : > { %457 = vset.pattern.permute.xlu0 %v485_v5  ;;  %s198_s23 = scalar_lea.vmem %s549_s0, %s424_s20  ;;  %s208_s27 = scalar_lea.vmem %s552_s3, %s425_s24 }
  0x11   : > { %299 = vperm.xlu0 %457, %v211_v0   ;;  %v210_v10 = vld [vmem:[%s198_s23] sm:$0xff] }
  0x12   : > { %v227_v15 = vrot.slane %v210_v10, %v226_v8  ;;  %v231_v16 = vrot.slane %v210_v10, %v230_v9  ;;  %v253_v17 = vrot.slane %v210_v10, %v252_v11  ;;  %v257_v18 = vrot.slane %v210_v10, %v256_v12 }
  0x13   : > { %v279_v19 = vrot.slane %v210_v10, %v278_v13  ;;  %v283_v20 = vrot.slane %v210_v10, %v282_v14  ;;  %v305_v31 = vrot.slane %v210_v10, %v304_v21  ;;  %v309_v32 = vrot.slane %v210_v10, %v308_v22 }
  0x14   : > { %v237_v23 = vrot.slane %v227_v15, %v226_v8  ;;  %v241_v24 = vrot.slane %v231_v16, %v226_v8  ;;  %v263_v27 = vrot.slane %v253_v17, %v252_v11  ;;  %v267_v28 = vrot.slane %v257_v18, %v252_v11 }
  0x15   : > { %v289_v29 = vrot.slane %v279_v19, %v278_v13  ;;  %v293_v30 = vrot.slane %v283_v20, %v278_v13  ;;  %v315_v43 = vrot.slane %v305_v31, %v304_v21  ;;  %v319_v44 = vrot.slane %v309_v32, %v304_v21 }
  0x87   : > { %v221_v25 = vpop.permute.xlu0 %220  ;;  %v248_v26 = vpop.permute.xlu1 %247 }
  0x88   : > { %v242_v33 = vmul.f32 %v237_v23, %v221_v25  ;;  %v243_v34 = vmul.f32 %v241_v24, %v221_v25  ;;  %v268_v36 = vmul.f32 %v263_v27, %v248_v26  ;;  %v269_v37 = vmul.f32 %v267_v28, %v248_v26 }
  0x8b   : > { %v216_v35 = vpop.permute.xlu0 %215 }
  0x8c   : > { %v244_v38 = vadd.f32 %v242_v33, %v216_v35  ;;  %v245_v39 = vadd.f32 %v243_v34, %v216_v35  ;;  %v274_v40 = vpop.permute.xlu1 %273 }
  0x8d   : > { %v294_v41 = vmul.f32 %v289_v29, %v274_v40  ;;  %v295_v42 = vmul.f32 %v293_v30, %v274_v40 }
  0x8e   : > { %v270_v45 = vadd.f32 %v268_v36, %v244_v38  ;;  %v271_v46 = vadd.f32 %v269_v37, %v245_v39 }
  0x90   : > { %v296_v47 = vadd.f32 %v294_v41, %v270_v45  ;;  %v297_v48 = vadd.f32 %v295_v42, %v271_v46  ;;  %v300_v49 = vpop.permute.xlu0 %299 }
  0x91   : > { %v320_v50 = vmul.f32 %v315_v43, %v300_v49  ;;  %v321_v51 = vmul.f32 %v319_v44, %v300_v49 }
  0x93   : > { %v322_v52 = vadd.f32 %v320_v50, %v296_v47  ;;  %v323_v53 = vadd.f32 %v321_v51, %v297_v48 }
  0x95   : > { %324 = vst [vmem:[%s208_s27] sm:$0xff] %v322_v52  ;;  %325 = vst [vmem:[%s208_s27 + $0x8] sm:$0xff] %v323_v53 }
  0x96 PF: > { %s13_s14 = sadd.s32 1, %s480_s14   ;;  %s553_s12 = smov %s476_s13 }
  0x97   : > { %p10_p5 = scmp.ge.s32.totalorder %s13_s14, 4   ;;  %s554_s13 = smov %s556_s15 }
  0x99   :  { %12 = sbr.rel (!%p10_p5) target bundleno = 2 (0x2), region = 62 }

</bundles_post_ra>
